<compile_context>
chip_gen: v7x
topology: tpu7x:2x2x1
jax: 0.10.0
libtpu: 0.0.40
codegen_flags: <defaults>
</compile_context>

<pallas_src>
import functools

import jax
import jax.numpy as jnp
from jax.experimental import pallas as pl
from jax.experimental.pallas import tpu as pltpu


def _focal_loss_kernel(x_ref, tgt_ref, wrow_ref, out_ref, *, gamma, n_total, tile_n):
    """out[n] = w[t_n] * (1 - p[n, t_n])**gamma * log_p[n, t_n]   (per-row, masked)."""
    pid = pl.program_id(0)

    x = x_ref[...].astype(jnp.float32)                       # (tile_n, C) f32 compute
    tn, c = x.shape

    # --- logsumexp along the class (lane) axis: the irreducible full-tile exp.
    m = jnp.max(x, axis=-1, keepdims=True)                   # (tile_n, 1)
    lse = jnp.log(jnp.sum(jnp.exp(x - m), axis=-1, keepdims=True)) + m
    # TODO(synk): for vocab-scale C add a trailing "arbitrary" grid axis over C chunks
    # with an online (running max + rescale) logsumexp so block bytes decouple from C.

    # --- gather the target logit via select + lane reduce (no float one-hot temp).
    col = jax.lax.broadcasted_iota(jnp.int32, (tn, c), 1)    # (tile_n, C)
    x_t = jnp.sum(jnp.where(col == tgt_ref[...], x, 0.0), axis=-1, keepdims=True)

    log_p = x_t - lse                                        # log_softmax at the target
    p = jnp.exp(log_p)                                       # only tile_n EUP exp's
    omp = jnp.maximum(1.0 - p, 0.0)                          # clamp: p can round above 1

    g = float(gamma)                                         # static (trace-time) branch
    if g == int(g) and int(g) >= 0:
        gi = int(g)
        focal_mod = jnp.ones_like(omp) if gi == 0 else omp
        for _ in range(gi - 1):
            focal_mod = focal_mod * omp                      # VPU multiplies, no pow
    else:
        focal_mod = omp ** jnp.float32(g)                    # non-integer gamma fallback
    focal_t = focal_mod * log_p                              # (tile_n, 1)

    w_t = wrow_ref[...].astype(jnp.float32)                  # pre-gathered w[t_n]

    # --- mask rows past the end of the batch (ragged last grid tile).  Keep the
    # where-select (NOT multiply-by-mask): garbage padded rows can be Inf/NaN.
    row = jax.lax.broadcasted_iota(jnp.int32, (tn, 1), 0) + pid * tile_n
    valid = row < n_total
    out_ref[...] = jnp.where(valid, w_t * focal_t, 0.0)


def focal_loss(inputs, targets, class_weight=1.0, gamma=2.0, tile_n=None):
    """inputs: (N, C) float, targets: (N,) int, class_weight: scalar or (C,) -> scalar f32."""
    n, c = inputs.shape
    itemsize = jnp.dtype(inputs.dtype).itemsize
    # dtype-aware sublane alignment: 8 rows (f32), 16 (bf16), 32 (int8)
    align = max(8, 32 // itemsize)

    if tile_n is None:
        # Byte-budgeted tile: largest aligned row count with the *native* logits block
        # under ~2 MiB (leaves room for double-buffering plus ~4 f32-block in-kernel
        # temporaries within every generation's scoped/physical VMEM, incl. v7x 64 MiB).
        budget_bytes = 2 * 1024 * 1024
        t = budget_bytes // max(1, c * itemsize)
        t = max(align, min(2048, (t // align) * align))
        tile_n = n if n <= t else t
    assert tile_n == n or tile_n % align == 0, (
        f"tile_n must be the full batch or a multiple of {align} for dtype {inputs.dtype}")

    grid_n = pl.cdiv(n, tile_n)

    # Side inputs: targets as (N,1) int32, per-row class weights pre-gathered in the
    # wrapper (removes the in-kernel one-hot weight gather entirely).
    tgt = targets.astype(jnp.int32).reshape(n, 1)
    w_vec = jnp.broadcast_to(jnp.asarray(class_weight), (c,))
    w_row = w_vec[targets].reshape(n, 1)                     # native dtype on the wire

    # Explicit scoped-VMEM limit: 2x native logits block (double buffer) + ~4 f32-block
    # intermediates (cast, exp(x-m), iota/compare/select) + small side blocks + slack.
    native_block = tile_n * c * itemsize
    f32_block = tile_n * c * 4
    side_blocks = 2 * tile_n * (4 + w_row.dtype.itemsize + 4)   # targets + w_row + out
    vmem_limit = 2 * native_block + 4 * f32_block + side_blocks + (1 << 20)
    vmem_limit = int(min(max(vmem_limit, 16 * 1024 * 1024), 64 * 1024 * 1024))

    per_row = pl.pallas_call(
        functools.partial(_focal_loss_kernel, gamma=gamma, n_total=n, tile_n=tile_n),
        out_shape=jax.ShapeDtypeStruct((n, 1), jnp.float32),
        grid_spec=pltpu.PrefetchScalarGridSpec(
            num_scalar_prefetch=0,
            grid=(grid_n,),
            in_specs=[
                # (optionally pipeline_mode=pl.Buffered(3) if a trace shows exposed DMA)
                pl.BlockSpec((tile_n, c), lambda i: (i, 0)),   # logits tile (native dtype)
                pl.BlockSpec((tile_n, 1), lambda i: (i, 0)),   # targets tile
                pl.BlockSpec((tile_n, 1), lambda i: (i, 0)),   # per-row class weights
            ],
            out_specs=pl.BlockSpec((tile_n, 1), lambda i: (i, 0)),  # per-row focal terms
        ),
        compiler_params=pltpu.CompilerParams(
            # No cross-iteration carry: independent tiles -> parallel (dual-TC on v7x).
            dimension_semantics=("parallel",),
            vmem_limit_bytes=vmem_limit,
        ),
    )(inputs, tgt, w_row)

    num = jnp.sum(per_row[:, 0])
    den = jnp.sum(w_row.astype(jnp.float32))
    # weighted 'mean' of nll_loss: -sum(w*focal)/sum(w). (den == 0 -> NaN, like PyTorch.)
    return -(num / den)


def focal_loss_ref(inputs, targets, class_weight, gamma=2.0):
    """Pure-JAX reference mirroring the PyTorch module."""
    log_prob = jax.nn.log_softmax(inputs.astype(jnp.float32), axis=-1)
    prob = jnp.exp(log_prob)
    focal = ((1.0 - prob) ** gamma) * log_prob
    picked = jnp.take_along_axis(focal, targets[:, None].astype(jnp.int32), axis=-1)[:, 0]
    w_n = jnp.broadcast_to(jnp.asarray(class_weight, jnp.float32), (inputs.shape[-1],))[targets]
    return -jnp.sum(w_n * picked) / jnp.sum(w_n)


if __name__ == "__main__":
    key = jax.random.PRNGKey(0)
    k1, k2, k3, k4, k5, k6 = jax.random.split(key, 6)

    # Case 1: small single-tile problem (batch=8, classes=32), uniform class weight
    # (matches the module default class_weight=1.0).
    N, C = 8, 32
    x1 = jax.random.normal(k1, (N, C), dtype=jnp.float32)
    t1 = jax.random.randint(k2, (N,), 0, C, dtype=jnp.int32)
    loss1 = focal_loss(x1, t1, class_weight=1.0, gamma=2.0)
    jax.block_until_ready(loss1)
    ref1 = focal_loss_ref(x1, t1, 1.0, gamma=2.0)
    assert jnp.allclose(loss1, ref1, atol=1e-5, rtol=1e-5), (loss1, ref1)

    # Case 2: exercise the multi-tile + ragged-tile masking path:
    # N=40 rows, tile_n=16 -> 3 grid steps, last tile half empty; non-uniform weights.
    N2, C2 = 40, 32
    x2 = jax.random.normal(k3, (N2, C2), dtype=jnp.float32)
    t2 = jax.random.randint(k4, (N2,), 0, C2, dtype=jnp.int32)
    w2 = jnp.linspace(0.5, 2.0, C2, dtype=jnp.float32)
    loss2 = focal_loss(x2, t2, w2, gamma=2.0, tile_n=16)
    jax.block_until_ready(loss2)
    ref2 = focal_loss_ref(x2, t2, w2, gamma=2.0)
    assert jnp.allclose(loss2, ref2, atol=1e-5, rtol=1e-5), (loss2, ref2)

    # Case 3: bf16 wire format (dtype-aware 16-row alignment), f32 compute inside.
    N3, C3 = 48, 32
    x3 = jax.random.normal(k5, (N3, C3), dtype=jnp.float32).astype(jnp.bfloat16)
    t3 = jax.random.randint(k6, (N3,), 0, C3, dtype=jnp.int32)
    w3 = jnp.linspace(0.5, 2.0, C3, dtype=jnp.float32)
    loss3 = focal_loss(x3, t3, w3, gamma=2.0, tile_n=16)
    jax.block_until_ready(loss3)
    ref3 = focal_loss_ref(x3, t3, w3, gamma=2.0)
    assert jnp.allclose(loss3, ref3, atol=1e-4, rtol=1e-4), (loss3, ref3)

    print("KERNEL_OK")
</pallas_src>

<mosaic_0001>
module attributes {stable_mosaic.version = 11 : i64} {
  func.func @_focal_loss_kernel(%arg0: i32, %arg1: memref<8x32xf32, #tpu.memory_space<vmem>>, %arg2: memref<8x1xi32, #tpu.memory_space<vmem>>, %arg3: memref<8x1xf32, #tpu.memory_space<vmem>>, %arg4: memref<8x1xf32, #tpu.memory_space<vmem>>) attributes {dimension_semantics = [#tpu.dimension_semantics<parallel>], iteration_bounds = array<i64: 1>, scalar_prefetch = 0 : i64, scratch_operands = 0 : i64, tpu.core_type = #tpu.core_type<tc>, window_params = [{transform_indices = @transform_0, window_bounds = array<i64: 8, 32>}, {transform_indices = @transform_1, window_bounds = array<i64: 8, 1>}, {transform_indices = @transform_2, window_bounds = array<i64: 8, 1>}, {transform_indices = @transform_3, window_bounds = array<i64: 8, 1>}]} {
    %c0 = arith.constant 0 : index
    %c0_0 = arith.constant 0 : index
    %0 = vector.load %arg1[%c0, %c0_0] : memref<8x32xf32, #tpu.memory_space<vmem>>, vector<8x32xf32>
    %cst = arith.constant dense<0xFF800000> : vector<8xf32>
    %1 = vector.multi_reduction <maximumf>, %0, %cst [1] : vector<8x32xf32> to vector<8xf32>
    %2 = vector.shape_cast %1 : vector<8xf32> to vector<8x1xf32>
    %3 = vector.broadcast %2 : vector<8x1xf32> to vector<8x32xf32>
    %4 = arith.subf %0, %3 : vector<8x32xf32>
    %5 = math.exp %4 : vector<8x32xf32>
    %cst_1 = arith.constant dense<0.000000e+00> : vector<8xf32>
    %6 = vector.multi_reduction <add>, %5, %cst_1 [1] : vector<8x32xf32> to vector<8xf32>
    %7 = vector.shape_cast %6 : vector<8xf32> to vector<8x1xf32>
    %8 = math.log %7 : vector<8x1xf32>
    %9 = arith.addf %8, %2 : vector<8x1xf32>
    %10 = tpu.iota {dimensions = array<i32: 1>} : vector<8x32xi32>
    %c0_2 = arith.constant 0 : index
    %c0_3 = arith.constant 0 : index
    %11 = vector.load %arg2[%c0_2, %c0_3] : memref<8x1xi32, #tpu.memory_space<vmem>>, vector<8x1xi32>
    %12 = vector.broadcast %11 : vector<8x1xi32> to vector<8x32xi32>
    %13 = arith.cmpi eq, %10, %12 : vector<8x32xi32>
    %cst_4 = arith.constant 0.000000e+00 : f32
    %14 = vector.broadcast %cst_4 : f32 to vector<8x32xf32>
    %15 = arith.select %13, %0, %14 : vector<8x32xi1>, vector<8x32xf32>
    %cst_5 = arith.constant dense<0.000000e+00> : vector<8xf32>
    %16 = vector.multi_reduction <add>, %15, %cst_5 [1] : vector<8x32xf32> to vector<8xf32>
    %17 = vector.shape_cast %16 : vector<8xf32> to vector<8x1xf32>
    %18 = arith.subf %17, %9 : vector<8x1xf32>
    %19 = math.exp %18 : vector<8x1xf32>
    %cst_6 = arith.constant 1.000000e+00 : f32
    %20 = vector.broadcast %cst_6 : f32 to vector<8x1xf32>
    %21 = arith.subf %20, %19 : vector<8x1xf32>
    %cst_7 = arith.constant 0.000000e+00 : f32
    %22 = vector.broadcast %cst_7 : f32 to vector<8x1xf32>
    %23 = arith.maximumf %21, %22 : vector<8x1xf32>
    %24 = arith.mulf %23, %23 : vector<8x1xf32>
    %25 = arith.mulf %24, %18 : vector<8x1xf32>
    %c0_8 = arith.constant 0 : index
    %c0_9 = arith.constant 0 : index
    %26 = vector.load %arg3[%c0_8, %c0_9] : memref<8x1xf32, #tpu.memory_space<vmem>>, vector<8x1xf32>
    %27 = tpu.iota {dimensions = array<i32: 0>} : vector<8x1xi32>
    %c8_i32 = arith.constant 8 : i32
    %28 = arith.muli %arg0, %c8_i32 : i32
    %29 = vector.broadcast %28 : i32 to vector<8x1xi32>
    %30 = arith.addi %27, %29 : vector<8x1xi32>
    %c8_i32_10 = arith.constant 8 : i32
    %31 = vector.broadcast %c8_i32_10 : i32 to vector<8x1xi32>
    %32 = arith.cmpi slt, %30, %31 : vector<8x1xi32>
    %33 = arith.mulf %26, %25 : vector<8x1xf32>
    %cst_11 = arith.constant 0.000000e+00 : f32
    %34 = vector.broadcast %cst_11 : f32 to vector<8x1xf32>
    %35 = arith.select %32, %33, %34 : vector<8x1xi1>, vector<8x1xf32>
    %c0_12 = arith.constant 0 : index
    %c0_13 = arith.constant 0 : index
    %36 = vector.load %arg4[%c0_12, %c0_13] : memref<8x1xf32, #tpu.memory_space<vmem>>, vector<8x1xf32>
    tpu.vector_store %arg4[%c0_12, %c0_13], %35 {strides = array<i32>} : memref<8x1xf32, #tpu.memory_space<vmem>>, vector<8x1xf32>,
    return
  }
  func.func @transform_0(%arg0: i32) -> (i32, i32) {
    %c0_i32 = arith.constant 0 : i32
    %c0_i32_0 = arith.constant 0 : i32
    return %arg0, %c0_i32 : i32, i32
  }
  func.func @transform_1(%arg0: i32) -> (i32, i32) {
    %c0_i32 = arith.constant 0 : i32
    %c0_i32_0 = arith.constant 0 : i32
    return %arg0, %c0_i32 : i32, i32
  }
  func.func @transform_2(%arg0: i32) -> (i32, i32) {
    %c0_i32 = arith.constant 0 : i32
    %c0_i32_0 = arith.constant 0 : i32
    return %arg0, %c0_i32 : i32, i32
  }
  func.func @transform_3(%arg0: i32) -> (i32, i32) {
    %c0_i32 = arith.constant 0 : i32
    %c0_i32_0 = arith.constant 0 : i32
    return %arg0, %c0_i32 : i32, i32
  }
}

</mosaic_0001>

<bundles_post_ra>
// kernel: tpu_custom_call.1
= control target key start
LH: loop header
LB: loop body
LE: loop exit
PB: predicated region body
PF: predicated region fallthrough
CT: control target
= control target key end

     0   :  { %vm15_vm0 = vcmask 261120   ;;  %v69_v1 = vmov 0   ;;  %v28_v7 = vlaneseq  ;;  %vm55_vm2 = vcmask 7168   ;;  %s105_s0 = inlined_call_operand.vmem [shape: f32[8,32], index: 0, kind: input, shape index: {}]   ;;  %s106_s1 = inlined_call_operand.vmem [shape: s32[8,1], index: 1, kind: input, shape index: {}]   ;;  %s107_s2 = inlined_call_operand.vmem [shape: f32[8,1], index: 2, kind: input, shape index: {}]   ;;  %s108_s3 = inlined_call_operand.vmem [shape: f32[8,1], index: 3, kind: output, shape index: {}]  }
   0x1   :  { %v14_v0 = vld [vmem:[%s105_s0] sm:$0xff]  ;;  %62 = vset.pattern.permute.xlu0 %v69_v1 }
   0x2   :  { %v16_v2 = vsel %vm15_vm0, %v14_v0, -inf  ;;  %v30_v3 = vld [vmem:[%s106_s1] sm:$0xff]  ;;  %v29_v8 = vand.u32 127, %v28_v7 }
   0x3   :  { %17 = vmax.xlane.f32.xlu0 %v16_v2  ;;  %v46_v25 = vld [vmem:[%s107_s2] sm:$0xff] }
  0x19   :  { %32 = vperm.xlu0 %62, %v30_v3  }
  0x90   :  { %v18_v4 = vpop.xlane.xlu0 %17 }
  0x91   :  { %v19_v5 = vsub.f32 %v14_v0, %v18_v4 }
  0x93   :  { %v20_v6 = vmul.f32 1.442695, %v19_v5 }
  0x95   :  { %63 = vpow2.f32 %v20_v6 }
  0x98   :  { %v33_v9 = vpop.permute.xlu0 %32 }
  0x99   :  { %vm34_vm1 = vcmp.eq.s32.totalorder %v29_v8, %v33_v9 }
  0x9a   :  { %v35_v11 = vsel %vm34_vm1, %v14_v0, 0.0 }
  0x9b   :  { %v36_v13 = vsel %vm15_vm0, %v35_v11, 0.0 }
  0x9f   :  { %v64_v10 = vpop.eup %63 }
  0xa0   :  { %v22_v12 = vsel %vm15_vm0, %v64_v10, 0.0 }
  0xa1   :  { %23 = vadd.xlane.f32.xlu1 %v22_v12 }
  0xa5   :  { %37 = vadd.xlane.f32.xlu1 %v36_v13 }
 0x12e   :  { %v24_v14 = vpop.xlane.xlu1 %23 }
 0x12f   :  { %65 = vlog2.f32 %v24_v14 }
 0x132   :  { %v38_v17 = vpop.xlane.xlu1 %37 }
 0x139   :  { %v66_v15 = vpop.eup %65 }
 0x13a   :  { %v26_v16 = vmul.f32 0.6931472, %v66_v15 }
 0x13c   :  { %v27_v18 = vadd.f32 %v26_v16, %v18_v4 }
 0x13e   :  { %v39_v19 = vsub.f32 %v38_v17, %v27_v18 }
 0x140   :  { %v40_v20 = vmul.f32 1.442695, %v39_v19 }
 0x142   :  { %67 = vpow2.f32 %v40_v20 }
 0x14c   :  { %v68_v21 = vpop.eup %67 }
 0x14d   :  { %v42_v22 = vsub.f32 1.0, %v68_v21 }
 0x14f   :  { %v43_v23 = vmax.f32 %v42_v22, 0.0 }
 0x151   :  { %v44_v24 = vmul.f32 %v43_v23, %v43_v23 }
 0x153   :  { %v45_v26 = vmul.f32 %v44_v24, %v39_v19 }
 0x155   :  { %v53_v27 = vmul.f32 %v46_v25, %v45_v26 }
 0x157   :  { %56 = vst.msk [vmem:[%s108_s3] sm:$0xff] %vm55_vm2, %v53_v27 }

</bundles_post_ra>
